<compile_context>
chip_gen: v5e
topology: v5e:2x2
jax: 0.10.0
libtpu: 0.0.40
codegen_flags: <defaults>
</compile_context>

<pallas_src>
import jax
import jax.numpy as jnp
from jax.experimental import pallas as pl
from jax.experimental.pallas import tpu as pltpu

IN_FEATURES = 2 * 128   # 256
H_PAD = 128             # hidden 64 zero-padded to a full lane width
C_PAD = 128             # classes zero-padded to a full lane width


def _cdiv(a, b):
    return -(-a // b)


def _round_up(x, m):
    return ((x + m - 1) // m) * m


def _make_kernel(use_bf16_mxu):
    def mlp_kernel(emb_ref, w1_ref, b1_ref, w2_ref, b2_ref, out_ref):
        x = emb_ref[...]
        w1 = w1_ref[...]
        w2 = w2_ref[...]
        if use_bf16_mxu:  # v5e: bf16-native MXU; keep f32 accumulation.
            x = x.astype(jnp.bfloat16)
            w1 = w1.astype(jnp.bfloat16)
            w2 = w2.astype(jnp.bfloat16)
        # First linear: (TILE_B, 256) @ (256, 128) + (1, 128)
        h = jnp.dot(x, w1, preferred_element_type=jnp.float32)
        h = jnp.maximum(h + b1_ref[...], 0.0)   # ReLU on lane-dense vregs (VALU filler)
        if use_bf16_mxu:
            h = h.astype(jnp.bfloat16)
        # Second linear: (TILE_B, 128) @ (128, 128) + (1, 128)
        out = jnp.dot(h, w2, preferred_element_type=jnp.float32)
        out_ref[...] = (out + b2_ref[...]).astype(out_ref.dtype)
    return mlp_kernel


def pad_params(w1, b1, w2, b2):
    """Pre-pad weights/biases ONCE at init (hoisted out of the per-call path).

    w1: (256, 64), b1: (64,) or (1, 64), w2: (64, C), b2: (C,) or (1, C).
    Zero padding keeps the math exact: padded hidden columns are 0 after ReLU,
    padded w2 rows are 0, padded class columns are sliced off in the wrapper.
    """
    IN, H = w1.shape
    C = w2.shape[1]
    w1p = jnp.zeros((IN, H_PAD), jnp.float32).at[:, :H].set(w1.astype(jnp.float32))
    b1p = jnp.zeros((1, H_PAD), jnp.float32).at[:, :H].set(
        jnp.reshape(b1, (1, H)).astype(jnp.float32))
    w2p = jnp.zeros((H_PAD, C_PAD), jnp.float32).at[:H, :C].set(w2.astype(jnp.float32))
    b2p = jnp.zeros((1, C_PAD), jnp.float32).at[:, :C].set(
        jnp.reshape(b2, (1, C)).astype(jnp.float32))
    return (w1p, b1p, w2p, b2p, C)


def _choose_tile_b(B, max_tile_b):
    """Batch tile: multiple of 8 sublanes, bounded ragged-tail waste, and an
    even grid of >=2 steps whenever possible so v7x's two TCs both get work."""
    n_tiles = max(1, _cdiv(B, max_tile_b))
    if B > 8:
        n_tiles = max(2, n_tiles)
        if n_tiles % 2:
            n_tiles += 1
    return max(8, _round_up(_cdiv(B, n_tiles), 8))


def target_classifier_forward(emb, padded_params, *, max_tile_b=2048,
                              use_bf16_mxu=False):
    """emb: (B, 256) in f32 or bf16 (streamed as-is). padded_params from pad_params()."""
    w1p, b1p, w2p, b2p, C = padded_params
    B, IN = emb.shape
    assert IN == IN_FEATURES

    tile_b = _choose_tile_b(B, max_tile_b)
    grid = (_cdiv(B, tile_b),)   # ragged last block -> Pallas masks the writeback

    flops = 2 * B * (IN * H_PAD + H_PAD * C_PAD)
    bytes_accessed = (emb.size * emb.dtype.itemsize
                      + 4 * (w1p.size + b1p.size + w2p.size + b2p.size)
                      + 4 * B * C_PAD)

    out = pl.pallas_call(
        _make_kernel(use_bf16_mxu),
        out_shape=jax.ShapeDtypeStruct((B, C_PAD), jnp.float32),
        grid=grid,
        in_specs=[
            pl.BlockSpec((tile_b, IN), lambda i: (i, 0)),   # streamed emb tiles
            pl.BlockSpec((IN, H_PAD), lambda i: (0, 0)),    # resident weights
            pl.BlockSpec((1, H_PAD), lambda i: (0, 0)),
            pl.BlockSpec((H_PAD, C_PAD), lambda i: (0, 0)),
            pl.BlockSpec((1, C_PAD), lambda i: (0, 0)),
        ],
        out_specs=pl.BlockSpec((tile_b, C_PAD), lambda i: (i, 0)),
        compiler_params=pltpu.CompilerParams(
            dimension_semantics=("parallel",),
        ),
        cost_estimate=pl.CostEstimate(
            flops=flops, transcendentals=0, bytes_accessed=bytes_accessed),
    )(emb, w1p, b1p, w2p, b2p)

    # Only the lane slice remains (no padded batch rows to strip).
    # TODO(synk): consumers that accept the (B, 128) lane-padded slab can skip this copy.
    return out[:, :C]


def init_params(key, num_classes_target):
    """Deterministic parameter init mirroring nn.Linear shapes.

    PyTorch: logits.weight (64, 256), logits.bias (64,),
             logits_simple.weight (C, 64), logits_simple.bias (C,)
    Stored pre-transposed here: (in, out).
    """
    k1, k2, k3, k4 = jax.random.split(key, 4)
    in1, out1 = 2 * 128, 64
    in2, out2 = 64, num_classes_target
    lim1 = 1.0 / jnp.sqrt(jnp.float32(in1))
    lim2 = 1.0 / jnp.sqrt(jnp.float32(in2))
    w1 = jax.random.uniform(k1, (in1, out1), jnp.float32, -lim1, lim1)
    b1 = jax.random.uniform(k2, (1, out1), jnp.float32, -lim1, lim1)
    w2 = jax.random.uniform(k3, (in2, out2), jnp.float32, -lim2, lim2)
    b2 = jax.random.uniform(k4, (1, out2), jnp.float32, -lim2, lim2)
    return w1, b1, w2, b2


if __name__ == "__main__":
    key = jax.random.PRNGKey(0)
    k_emb, k_params = jax.random.split(key)

    batch = 8
    num_classes_target = 10

    emb = jax.random.normal(k_emb, (batch, 2 * 128), dtype=jnp.float32)
    w1, b1, w2, b2 = init_params(k_params, num_classes_target)

    # Pad weights once at init (hoisted out of the per-forward path).
    padded_params = pad_params(w1, b1, w2, b2)

    pred = target_classifier_forward(emb, padded_params)
    pred = jax.block_until_ready(pred)

    # Reference check in plain JAX (same semantics as the PyTorch module).
    ref = jnp.maximum(emb @ w1 + b1, 0.0) @ w2 + b2
    assert pred.shape == (batch, num_classes_target)
    assert jnp.allclose(pred, ref, atol=1e-5, rtol=1e-5)

    print("KERNEL_OK")
</pallas_src>

<mosaic_0001>
module attributes {stable_mosaic.version = 11 : i64} {
  func.func @mlp_kernel(%arg0: i32, %arg1: memref<8x256xf32, #tpu.memory_space<vmem>>, %arg2: memref<256x128xf32, #tpu.memory_space<vmem>>, %arg3: memref<1x128xf32, #tpu.memory_space<vmem>>, %arg4: memref<128x128xf32, #tpu.memory_space<vmem>>, %arg5: memref<1x128xf32, #tpu.memory_space<vmem>>, %arg6: memref<8x128xf32, #tpu.memory_space<vmem>>) attributes {dimension_semantics = [#tpu.dimension_semantics<parallel>], iteration_bounds = array<i64: 1>, scalar_prefetch = 0 : i64, scratch_operands = 0 : i64, tpu.core_type = #tpu.core_type<tc>, window_params = [{transform_indices = @transform_0, window_bounds = array<i64: 8, 256>}, {pipeline_mode = #tpu.pipeline_mode<synchronous>, transform_indices = @transform_1, window_bounds = array<i64: 256, 128>}, {pipeline_mode = #tpu.pipeline_mode<synchronous>, transform_indices = @transform_2, window_bounds = array<i64: 1, 128>}, {pipeline_mode = #tpu.pipeline_mode<synchronous>, transform_indices = @transform_3, window_bounds = array<i64: 128, 128>}, {pipeline_mode = #tpu.pipeline_mode<synchronous>, transform_indices = @transform_4, window_bounds = array<i64: 1, 128>}, {transform_indices = @transform_5, window_bounds = array<i64: 8, 128>}]} {
    %c0 = arith.constant 0 : index
    %c0_0 = arith.constant 0 : index
    %0 = vector.load %arg1[%c0, %c0_0] : memref<8x256xf32, #tpu.memory_space<vmem>>, vector<8x256xf32>
    %c0_1 = arith.constant 0 : index
    %c0_2 = arith.constant 0 : index
    %1 = vector.load %arg2[%c0_1, %c0_2] : memref<256x128xf32, #tpu.memory_space<vmem>>, vector<256x128xf32>
    %c0_3 = arith.constant 0 : index
    %c0_4 = arith.constant 0 : index
    %2 = vector.load %arg4[%c0_3, %c0_4] : memref<128x128xf32, #tpu.memory_space<vmem>>, vector<128x128xf32>
    %cst = arith.constant dense<0.000000e+00> : vector<8x128xf32>
    %3 = tpu.matmul %0, %1, %cst {dimension_numbers = #tpu.dot_dimension_numbers<[1], [0], [0], [1], [0, 0, 1, 1], [], []>} : vector<8x256xf32>, vector<256x128xf32>, vector<8x128xf32> -> vector<8x128xf32>
    %c0_5 = arith.constant 0 : index
    %c0_6 = arith.constant 0 : index
    %4 = vector.load %arg3[%c0_5, %c0_6] : memref<1x128xf32, #tpu.memory_space<vmem>>, vector<1x128xf32>
    %5 = vector.broadcast %4 : vector<1x128xf32> to vector<8x128xf32>
    %6 = arith.addf %3, %5 : vector<8x128xf32>
    %cst_7 = arith.constant 0.000000e+00 : f32
    %7 = vector.broadcast %cst_7 : f32 to vector<8x128xf32>
    %8 = arith.maximumf %6, %7 : vector<8x128xf32>
    %cst_8 = arith.constant dense<0.000000e+00> : vector<8x128xf32>
    %9 = tpu.matmul %8, %2, %cst_8 {dimension_numbers = #tpu.dot_dimension_numbers<[1], [0], [0], [1], [0, 0, 1, 1], [], []>} : vector<8x128xf32>, vector<128x128xf32>, vector<8x128xf32> -> vector<8x128xf32>
    %c0_9 = arith.constant 0 : index
    %c0_10 = arith.constant 0 : index
    %10 = vector.load %arg5[%c0_9, %c0_10] : memref<1x128xf32, #tpu.memory_space<vmem>>, vector<1x128xf32>
    %11 = vector.broadcast %10 : vector<1x128xf32> to vector<8x128xf32>
    %12 = arith.addf %9, %11 : vector<8x128xf32>
    %c0_11 = arith.constant 0 : index
    %c0_12 = arith.constant 0 : index
    %13 = vector.load %arg6[%c0_11, %c0_12] : memref<8x128xf32, #tpu.memory_space<vmem>>, vector<8x128xf32>
    tpu.vector_store %arg6[%c0_11, %c0_12], %12 {strides = array<i32>} : memref<8x128xf32, #tpu.memory_space<vmem>>, vector<8x128xf32>,
    return
  }
  func.func @transform_0(%arg0: i32) -> (i32, i32) {
    %c0_i32 = arith.constant 0 : i32
    %c0_i32_0 = arith.constant 0 : i32
    return %arg0, %c0_i32 : i32, i32
  }
  func.func @transform_1(%arg0: i32) -> (i32, i32) {
    %c0_i32 = arith.constant 0 : i32
    %c0_i32_0 = arith.constant 0 : i32
    %c0_i32_1 = arith.constant 0 : i32
    return %c0_i32, %c0_i32_0 : i32, i32
  }
  func.func @transform_2(%arg0: i32) -> (i32, i32) {
    %c0_i32 = arith.constant 0 : i32
    %c0_i32_0 = arith.constant 0 : i32
    %c0_i32_1 = arith.constant 0 : i32
    return %c0_i32, %c0_i32_0 : i32, i32
  }
  func.func @transform_3(%arg0: i32) -> (i32, i32) {
    %c0_i32 = arith.constant 0 : i32
    %c0_i32_0 = arith.constant 0 : i32
    %c0_i32_1 = arith.constant 0 : i32
    return %c0_i32, %c0_i32_0 : i32, i32
  }
  func.func @transform_4(%arg0: i32) -> (i32, i32) {
    %c0_i32 = arith.constant 0 : i32
    %c0_i32_0 = arith.constant 0 : i32
    %c0_i32_1 = arith.constant 0 : i32
    return %c0_i32, %c0_i32_0 : i32, i32
  }
  func.func @transform_5(%arg0: i32) -> (i32, i32) {
    %c0_i32 = arith.constant 0 : i32
    %c0_i32_0 = arith.constant 0 : i32
    return %arg0, %c0_i32 : i32, i32
  }
}

</mosaic_0001>

<bundles_post_ra>
// kernel: tpu_custom_call.1
= control target key start
LH: loop header
LB: loop body
LE: loop exit
PB: predicated region body
PF: predicated region fallthrough
CT: control target
= control target key end

     0   :  { %10 = vsyncpa [#allocation3], 0  ;;  %s368_s0 = inlined_call_operand.hbm [shape: f32[8,256], index: 0, kind: input, shape index: {}]   ;;  %s369_s1 = inlined_call_operand.hbm [shape: f32[256,128], index: 1, kind: input, shape index: {}]   ;;  %s370_s2 = inlined_call_operand.vmem [shape: f32[1,128], index: 2, kind: input, shape index: {}]   ;;  %s371_s3 = inlined_call_operand.hbm [shape: f32[128,128], index: 3, kind: input, shape index: {}]   ;;  %s372_s4 = inlined_call_operand.vmem [shape: f32[1,128], index: 4, kind: input, shape index: {}]   ;;  %s373_s5 = inlined_call_operand.hbm [shape: f32[8,128], index: 5, kind: output, shape index: {}]  }
   0x1   :  { %11 = vsyncpa [#allocation6], 0  ;;  %s28_s20 = sshll.u32 %s369_s1, 4  ;;  %s29_s20 = int_to_ptr.hbm [resolvable:$true] %s28_s20 }
   0x2   :  { %12 = vsyncpa [#allocation4], 0  ;;  %s314_s21 = smov [#allocation5]   ;;  %s18_s25 = sshll.u32 %s368_s0, 4  ;;  %s19_s25 = int_to_ptr.hbm [resolvable:$true] %s18_s25 }
   0x3   :  { %s30_s22 = sshll.u32 %s314_s21, 4  ;;  %s315_s26 = smov 128   ;;  %s31_s22 = int_to_ptr.vmem [resolvable:$true] %s30_s22 }
   0x4   :  { %s316_s27 = smov 8   ;;  %s317_s28 = smov [#allocation2]  }
   0x5   :  { %36 = dma.hbm_to_vmem [thread:$0]  %s29_s20, 4096, %s31_s22, [#allocation6], %s315_s26, %s315_s26, %s316_s27  }
   0x6   :  { %s20_s29 = sshll.u32 %s317_s28, 4  ;;  %s43_s7 = sshll.u32 %s371_s3, 4  ;;  %s21_s29 = int_to_ptr.vmem [resolvable:$true] %s20_s29  ;;  %s44_s7 = int_to_ptr.hbm [resolvable:$true] %s43_s7 }
   0x7   :  { %23 = dma.hbm_to_vmem [thread:$0]  %s19_s25, 256, %s21_s29, [#allocation3]  }
   0x8   :  { %s318_s1 = smov [#allocation7]  }
   0x9   :  { %s45_s8 = sshll.u32 %s318_s1, 4  ;;  %s46_s8 = int_to_ptr.vmem [resolvable:$true] %s45_s8 }
   0xa   :  { %51 = dma.hbm_to_vmem [thread:$0]  %s44_s7, 2048, %s46_s8, [#allocation6], %s315_s26, %s315_s26, %s316_s27  }
   0xb   :  { %308 = dma.done.wait [#allocation3], 256  }
   0xc   :  { %309 = vsyncadd [#allocation3], 4294967040 }
   0xd   :  { %310 = dma.done.wait [#allocation6], 6144  }
   0xe   :  { %311 = vsyncadd [#allocation6], 4294961152  ;;  %v83_v0 = vld [vmem:[#allocation5 + $0x78] sm:$0xff]  ;;  %v82_v1 = vld [vmem:[#allocation5 + $0x70] sm:$0xff]  ;;  %s319_s11 = smov [#allocation8]   ;;  %s193_s15 = sshll.u32 %s373_s5, 4  ;;  %s194_s15 = int_to_ptr.hbm [resolvable:$true] %s193_s15 }
   0xf   :  { %v99_v2 = vld [vmem:[#allocation5 + $0xf8] sm:$0xff]  ;;  %120 = vmatpush.msra.mxu0 %v83_v0  ;;  %v98_v3 = vld [vmem:[#allocation5 + $0xf0] sm:$0xff]  ;;  %v81_v4 = vld [vmem:[#allocation5 + $0x68] sm:$0xff]  ;;  %s191_s12 = sshll.u32 %s319_s11, 4  ;;  %s192_s12 = int_to_ptr.vmem [resolvable:$true] %s191_s12 }
  0x10   :  { %140 = vmatpush.msra.mxu1 %v99_v2  ;;  %v97_v5 = vld [vmem:[#allocation5 + $0xe8] sm:$0xff]  ;;  %v80_v6 = vld [vmem:[#allocation5 + $0x60] sm:$0xff]  ;;  %v79_v8 = vld [vmem:[#allocation5 + $0x58] sm:$0xff] }
  0x11   :  { %121 = vmatpush.msra.mxu0 %v82_v1  ;;  %v96_v7 = vld [vmem:[#allocation5 + $0xe0] sm:$0xff]  ;;  %v95_v9 = vld [vmem:[#allocation5 + $0xd8] sm:$0xff]  ;;  %v78_v10 = vld [vmem:[#allocation5 + $0x50] sm:$0xff] }
  0x12   :  { %141 = vmatpush.msra.mxu1 %v98_v3  ;;  %v94_v11 = vld [vmem:[#allocation5 + $0xd0] sm:$0xff]  ;;  %v77_v12 = vld [vmem:[#allocation5 + $0x48] sm:$0xff]  ;;  %v115_v14 = vld [vmem:[#allocation7 + $0x78] sm:$0xff] }
  0x13   :  { %122 = vmatpush.msra.mxu0 %v81_v4  ;;  %v93_v13 = vld [vmem:[#allocation5 + $0xc8] sm:$0xff]  ;;  %v114_v15 = vld [vmem:[#allocation7 + $0x70] sm:$0xff]  ;;  %v76_v16 = vld [vmem:[#allocation5 + $0x40] sm:$0xff]  ;;  %165 = vmatpush.msra.mxu2 %v115_v14 }
  0x14   :  { %142 = vmatpush.msra.mxu1 %v97_v5  ;;  %v92_v17 = vld [vmem:[#allocation5 + $0xc0] sm:$0xff]  ;;  %v113_v18 = vld [vmem:[#allocation7 + $0x68] sm:$0xff]  ;;  %v75_v19 = vld [vmem:[#allocation5 + $0x38] sm:$0xff] }
  0x15   :  { %123 = vmatpush.msra.mxu0 %v80_v6  ;;  %v91_v20 = vld [vmem:[#allocation5 + $0xb8] sm:$0xff]  ;;  %166 = vmatpush.msra.mxu2 %v114_v15  ;;  %v112_v21 = vld [vmem:[#allocation7 + $0x60] sm:$0xff]  ;;  %v74_v22 = vld [vmem:[#allocation5 + $0x30] sm:$0xff] }
  0x16   :  { %143 = vmatpush.msra.mxu1 %v96_v7  ;;  %v90_v23 = vld [vmem:[#allocation5 + $0xb0] sm:$0xff]  ;;  %v111_v24 = vld [vmem:[#allocation7 + $0x58] sm:$0xff]  ;;  %v73_v25 = vld [vmem:[#allocation5 + $0x28] sm:$0xff] }
  0x17   :  { %124 = vmatpush.msra.mxu0 %v79_v8  ;;  %167 = vmatpush.msra.mxu2 %v113_v18  ;;  %v89_v26 = vld [vmem:[#allocation5 + $0xa8] sm:$0xff]  ;;  %v110_v27 = vld [vmem:[#allocation7 + $0x50] sm:$0xff]  ;;  %v72_v28 = vld [vmem:[#allocation5 + $0x20] sm:$0xff] }
  0x18   :  { %144 = vmatpush.msra.mxu1 %v95_v9  ;;  %v88_v29 = vld [vmem:[#allocation5 + $0xa0] sm:$0xff]  ;;  %v109_v30 = vld [vmem:[#allocation7 + $0x48] sm:$0xff]  ;;  %v71_v31 = vld [vmem:[#allocation5 + $0x18] sm:$0xff] }
  0x19   :  { %125 = vmatpush.msra.mxu0 %v78_v10  ;;  %168 = vmatpush.msra.mxu2 %v112_v21  ;;  %v87_v32 = vld [vmem:[#allocation5 + $0x98] sm:$0xff]  ;;  %v108_v33 = vld [vmem:[#allocation7 + $0x40] sm:$0xff]  ;;  %v70_v34 = vld [vmem:[#allocation5 + $0x10] sm:$0xff] }
  0x1a   :  { %145 = vmatpush.msra.mxu1 %v94_v11  ;;  %v86_v35 = vld [vmem:[#allocation5 + $0x90] sm:$0xff]  ;;  %v107_v36 = vld [vmem:[#allocation7 + $0x38] sm:$0xff]  ;;  %v69_v37 = vld [vmem:[#allocation5 + $0x8] sm:$0xff] }
  0x1b   :  { %126 = vmatpush.msra.mxu0 %v77_v12  ;;  %169 = vmatpush.msra.mxu2 %v111_v24  ;;  %v85_v38 = vld [vmem:[#allocation5 + $0x88] sm:$0xff]  ;;  %v106_v39 = vld [vmem:[#allocation7 + $0x30] sm:$0xff]  ;;  %v68_v40 = vld [vmem:[#allocation5] sm:$0xff] }
  0x1c   :  { %146 = vmatpush.msra.mxu1 %v93_v13  ;;  %v84_v41 = vld [vmem:[#allocation5 + $0x80] sm:$0xff]  ;;  %v66_v42 = vld [vmem:[#allocation2] sm:$0xff]  ;;  %v67_v43 = vld [vmem:[#allocation2 + $0x8] sm:$0xff] }
  0x1d   :  { %127 = vmatpush.msra.mxu0 %v76_v16  ;;  %170 = vmatpush.msra.mxu2 %v110_v27  ;;  %v105_v44 = vld [vmem:[#allocation7 + $0x28] sm:$0xff]  ;;  %v104_v45 = vld [vmem:[#allocation7 + $0x20] sm:$0xff]  ;;  %v103_v46 = vld [vmem:[#allocation7 + $0x18] sm:$0xff] }
  0x1e   :  { %147 = vmatpush.msra.mxu1 %v92_v17  ;;  %v102_v47 = vld [vmem:[#allocation7 + $0x10] sm:$0xff]  ;;  %v101_v48 = vld [vmem:[#allocation7 + $0x8] sm:$0xff]  ;;  %v100_v49 = vld [vmem:[#allocation7] sm:$0xff] }
  0x1f   :  { %128 = vmatpush.msra.mxu0 %v75_v19  ;;  %171 = vmatpush.msra.mxu2 %v109_v30  ;;  %v210_v50 = vld [vmem:[%s370_s2] ss:$0 sm:$0xff] }
  0x20   :  { %148 = vmatpush.msra.mxu1 %v91_v20  ;;  %v211_v56 = vld [vmem:[%s372_s4] ss:$0 sm:$0xff] }
  0x21   :  { %129 = vmatpush.msra.mxu0 %v74_v22  ;;  %172 = vmatpush.msra.mxu2 %v108_v33 }
  0x22   :  { %149 = vmatpush.msra.mxu1 %v90_v23 }
  0x23   :  { %130 = vmatpush.msra.mxu0 %v73_v25  ;;  %173 = vmatpush.msra.mxu2 %v107_v36 }
  0x24   :  { %150 = vmatpush.msra.mxu1 %v89_v26 }
  0x25   :  { %131 = vmatpush.msra.mxu0 %v72_v28  ;;  %174 = vmatpush.msra.mxu2 %v106_v39 }
  0x26   :  { %151 = vmatpush.msra.mxu1 %v88_v29 }
  0x27   :  { %132 = vmatpush.msra.mxu0 %v71_v31  ;;  %175 = vmatpush.msra.mxu2 %v105_v44 }
  0x28   :  { %152 = vmatpush.msra.mxu1 %v87_v32 }
  0x29   :  { %133 = vmatpush.msra.mxu0 %v70_v34  ;;  %176 = vmatpush.msra.mxu2 %v104_v45 }
  0x2a   :  { %153 = vmatpush.msra.mxu1 %v86_v35 }
  0x2b   :  { %134 = vmatpush.msra.mxu0 %v69_v37  ;;  %177 = vmatpush.msra.mxu2 %v103_v46 }
  0x2c   :  { %154 = vmatpush.msra.mxu1 %v85_v38 }
  0x2d   :  { %135 = vmatpush.msra.mxu0 %v68_v40  ;;  %178 = vmatpush.msra.mxu2 %v102_v47 }
  0x2e   :  { %155 = vmatpush.msra.mxu1 %v84_v41  ;;  %136 = vmatmul.f32.vlgmr.msra.gmra.mxu0 %v66_v42 }
  0x2f   :  { %156 = vmatmul.f32.vlgmr.msra.gmra.mxu1 %v67_v43  ;;  %179 = vmatpush.msra.mxu2 %v101_v48 }
  0x31   :  { %180 = vmatpush.msra.mxu2 %v100_v49 }
  0xab   :  { %v137_v51 = vpop.f32.mrf.mxu0 }
  0xac   :  { %v157_v52 = vpop.f32.mrf.mxu1  ;;  %v138_v53 = vadd.f32 %v210_v50, %v137_v51 }
  0xae   :  { %v158_v54 = vadd.f32 %v157_v52, %v138_v53 }
  0xb0   :  { %v160_v55 = vmax.f32 %v158_v54, 0.0 }
  0xb2   :  { %181 = vmatmul.f32.vlgmr.msra.gmra.mxu2 %v160_v55 }
 0x135   :  { %v182_v57 = vpop.f32.mrf.mxu2 }
 0x136   :  { %v183_v58 = vadd.f32 %v211_v56, %v182_v57 }
 0x138   :  { %185 = vst [vmem:[#allocation8] sm:$0xff] %v183_v58 }
 0x139   :  { %196 = dma.vmem_to_hbm [thread:$0]  %s192_s12, 128, %s194_s15, [#allocation4]  }
 0x13a   :  { %312 = dma.done.wait [#allocation4], 128  }
 0x13b   :  { %313 = vsyncadd [#allocation4], 4294967168 }
 0x13c   :  { %201 = vsyncpa [#allocation3], 1 }
 0x13d   :  { %202 = vsyncpa [#allocation6], 1 }
 0x13e   :  { %203 = vsyncpa [#allocation4], 1 }

</bundles_post_ra>
